<compile_context>
chip_gen: v7x
topology: tpu7x:2x2x1
jax: 0.10.0
libtpu: 0.0.40
codegen_flags: <defaults>
</compile_context>

<pallas_src>
import functools

import jax
import jax.numpy as jnp
from jax import lax
from jax.experimental import pallas as pl
from jax.experimental.pallas import tpu as pltpu

_HI = jax.lax.Precision.HIGHEST


def _conv_bn_relu_kernel(x_ref, w_ref, gamma_ref, beta_ref, out_ref,
                         *, N, H, W, Cout, eps):
    """Fused conv3x3 (banded per-dy weights) + BatchNorm2d (batch stats) + ReLU.

    x_ref     : (3, N*H, (W+2)*Cin)  f32  per-dy stacked-M LHS (batch in M)
    w_ref     : (3, (W+2)*Cin, W*Cout) f32 per-dy banded conv weights
    gamma_ref : (1, W*Cout)          f32  BN gamma tiled over w
    beta_ref  : (1, W*Cout)          f32  BN beta  tiled over w
    out_ref   : (N*H, W*Cout)        f32  lane-dense output slab
    """
    w_cout = W * Cout

    # ---- conv: 3 banded matmuls, each RHS pushed to the MXU exactly once ----
    acc = jnp.dot(x_ref[0], w_ref[0], precision=_HI,
                  preferred_element_type=jnp.float32)
    for dy in range(1, 3):
        acc = acc + jnp.dot(x_ref[dy], w_ref[dy], precision=_HI,
                            preferred_element_type=jnp.float32)
    # NOTE: conv bias intentionally omitted -- cancelled exactly by training-
    # mode batch norm (the batch mean absorbs a per-channel constant).

    # ---- BatchNorm2d batch statistics, single fused pass --------------------
    col_s1 = jnp.sum(acc, axis=0, keepdims=True)          # (1, W*Cout)
    col_s2 = jnp.sum(acc * acc, axis=0, keepdims=True)    # (1, W*Cout)
    stats = jnp.concatenate([col_s1, col_s2], axis=0)     # (2, W*Cout)

    # Per-channel sum over the W lane groups, already re-broadcast across the
    # groups: log2(W) rounds of XLU roll-add (lane axis length == W*Cout, so
    # rolling by multiples of Cout permutes whole w-groups per channel).
    shift = Cout
    while shift < w_cout:
        stats = stats + pltpu.roll(stats, shift=shift, axis=1)
        shift *= 2

    inv_m = 1.0 / float(N * H * W)
    mean = stats[0:1, :] * inv_m
    ex2 = stats[1:2, :] * inv_m
    # TODO(synk): for large N*H*W use centered/two-pass partial sums instead of
    # E[x^2]-mean^2 (cancellation risk at production sizes).
    var = jnp.maximum(ex2 - mean * mean, 0.0)
    scale = gamma_ref[...] * lax.rsqrt(var + eps)          # (1, W*Cout)
    shift_b = beta_ref[...] - mean * scale

    # ---- normalize + ReLU, unmasked full-lane stores ------------------------
    out_ref[...] = jnp.maximum(acc * scale + shift_b, 0.0)


def _prepare_banded_weights(w_oihw, W):
    """(Cout, Cin, 3, 3) -> (3, (W+2)*Cin, W*Cout) per-dy banded matrices.

    Callers that reuse the same conv weights should cache this result (avoids
    re-materializing expanded weights in HBM every call).
    """
    Cin, Cout = w_oihw.shape[1], w_oihw.shape[0]
    w_taps = jnp.transpose(w_oihw.astype(jnp.float32), (2, 3, 1, 0))  # (3,3,Cin,Cout)
    rows = jnp.arange(W)
    shift = jnp.zeros((3, W + 2, W), jnp.float32)
    for dx in range(3):
        shift = shift.at[dx, rows + dx, rows].set(1.0)     # shift[dx, w+dx, w] = 1
    wband = jnp.einsum('xvw,yxio->yviwo', shift, w_taps)   # (3, W+2, Cin, W, Cout)
    return wband.reshape(3, (W + 2) * Cin, W * Cout)


def conv_batch_norm(x_nchw, w_oihw, bias, gamma, beta, eps=1e-5):
    """ConvBatchNorm forward.  Accepts/returns PyTorch NCHW layout."""
    x = jnp.transpose(x_nchw, (0, 2, 3, 1)).astype(jnp.float32)   # NHWC
    N, H, W, Cin = x.shape
    Cout = w_oihw.shape[0]
    del bias  # per-channel conv bias cancels exactly under training-mode BN

    assert W & (W - 1) == 0, "roll-add BN reduction assumes power-of-two W"
    # TODO(synk): fall back to a (single, stacked) gsum matmul for other W.

    # padding=1 halo + pack (w, ci) onto lanes; per-dy stacked-M LHS built once.
    # TODO(synk): at production sizes fuse this pad/pack into the kernel
    # (saves an extra HBM pass over the activations).
    xpad = jnp.pad(x, ((0, 0), (1, 1), (1, 1), (0, 0)))
    xp2 = xpad.reshape(N, H + 2, (W + 2) * Cin)
    x_dy = jnp.stack(
        [xp2[:, dy:dy + H, :].reshape(N * H, (W + 2) * Cin) for dy in range(3)])

    wband = _prepare_banded_weights(w_oihw, W)              # (3, (W+2)*Cin, W*Cout)
    g_t = jnp.tile(gamma.astype(jnp.float32), W).reshape(1, W * Cout)
    b_t = jnp.tile(beta.astype(jnp.float32), W).reshape(1, W * Cout)

    # VMEM budget check (v7x has only 64 MiB/TC; BlockSpec may double-buffer).
    in_bytes = sum(int(a.size) * 4 for a in (x_dy, wband, g_t, b_t))
    out_bytes = N * H * W * Cout * 4
    est_vmem = 2 * (in_bytes + out_bytes) + (2 << 20)       # 2x buffers + slack
    assert est_vmem < (24 << 20), f"VMEM footprint too large: {est_vmem}"

    kernel = functools.partial(_conv_bn_relu_kernel, N=N, H=H, W=W,
                               Cout=Cout, eps=float(eps))

    out2d = pl.pallas_call(
        kernel,
        out_shape=jax.ShapeDtypeStruct((N * H, W * Cout), jnp.float32),
        grid=(1,),   # BN needs full-batch statistics; whole problem fits VMEM
        in_specs=[
            pl.BlockSpec(x_dy.shape, lambda i: (0, 0, 0)),
            pl.BlockSpec(wband.shape, lambda i: (0, 0, 0)),
            pl.BlockSpec(g_t.shape, lambda i: (0, 0)),
            pl.BlockSpec(b_t.shape, lambda i: (0, 0)),
        ],
        out_specs=pl.BlockSpec((N * H, W * Cout), lambda i: (0, 0)),
        compiler_params=pltpu.CompilerParams(
            dimension_semantics=("arbitrary",),
            vmem_limit_bytes=32 * 1024 * 1024),
    )(x_dy, wband, g_t, b_t)

    out_nhwc = out2d.reshape(N, H, W, Cout)
    return jnp.transpose(out_nhwc, (0, 3, 1, 2))            # back to NCHW


def _reference(x_nchw, w_oihw, bias, gamma, beta, eps=1e-5):
    """Pure-JAX reference matching PyTorch forward (training-mode BN)."""
    out = lax.conv_general_dilated(
        x_nchw, w_oihw, window_strides=(1, 1), padding=((1, 1), (1, 1)),
        dimension_numbers=('NCHW', 'OIHW', 'NCHW'), precision=_HI)
    out = out + bias.reshape(1, -1, 1, 1)
    mean = jnp.mean(out, axis=(0, 2, 3), keepdims=True)
    var = jnp.mean((out - mean) ** 2, axis=(0, 2, 3), keepdims=True)
    out = (out - mean) / jnp.sqrt(var + eps)
    out = out * gamma.reshape(1, -1, 1, 1) + beta.reshape(1, -1, 1, 1)
    return jnp.maximum(out, 0.0)


if __name__ == "__main__":
    # Small shapes consistent with the module: batch=2, in_channels=4,
    # out_channels=8, spatial=16x16  (W * Cout = 128 -> fully lane-dense).
    N, Cin, Cout, H, W = 2, 4, 8, 16, 16

    key = jax.random.PRNGKey(0)
    kx, kw, kb, kg, kbt = jax.random.split(key, 5)

    x = jax.random.normal(kx, (N, Cin, H, W), dtype=jnp.float32)

    fan_in = Cin * 3 * 3
    bound = 1.0 / (fan_in ** 0.5)
    w_oihw = jax.random.uniform(kw, (Cout, Cin, 3, 3), jnp.float32, -bound, bound)
    bias = jax.random.uniform(kb, (Cout,), jnp.float32, -bound, bound)
    gamma = jax.random.uniform(kg, (Cout,), jnp.float32, 0.5, 1.5)
    beta = jax.random.uniform(kbt, (Cout,), jnp.float32, -0.5, 0.5)

    out = jax.jit(conv_batch_norm)(x, w_oihw, bias, gamma, beta)
    out = jax.block_until_ready(out)

    ref = _reference(x, w_oihw, bias, gamma, beta)
    assert out.shape == (N, Cout, H, W), out.shape
    assert jnp.allclose(out, ref, atol=1e-4, rtol=1e-4), (
        float(jnp.max(jnp.abs(out - ref))))

    print("KERNEL_OK")
</pallas_src>

<mosaic_0001>
module attributes {stable_mosaic.version = 11 : i64} {
  func.func @_conv_bn_relu_kernel(%arg0: i32, %arg1: memref<3x32x72xf32, #tpu.memory_space<vmem>>, %arg2: memref<3x72x128xf32, #tpu.memory_space<vmem>>, %arg3: memref<1x128xf32, #tpu.memory_space<vmem>>, %arg4: memref<1x128xf32, #tpu.memory_space<vmem>>, %arg5: memref<32x128xf32, #tpu.memory_space<vmem>>) attributes {dimension_semantics = [#tpu.dimension_semantics<arbitrary>], iteration_bounds = array<i64: 1>, scalar_prefetch = 0 : i64, scratch_operands = 0 : i64, tpu.core_type = #tpu.core_type<tc>, window_params = [{pipeline_mode = #tpu.pipeline_mode<synchronous>, transform_indices = @transform_0, window_bounds = array<i64: 3, 32, 72>}, {pipeline_mode = #tpu.pipeline_mode<synchronous>, transform_indices = @transform_1, window_bounds = array<i64: 3, 72, 128>}, {pipeline_mode = #tpu.pipeline_mode<synchronous>, transform_indices = @transform_2, window_bounds = array<i64: 1, 128>}, {pipeline_mode = #tpu.pipeline_mode<synchronous>, transform_indices = @transform_3, window_bounds = array<i64: 1, 128>}, {pipeline_mode = #tpu.pipeline_mode<synchronous>, transform_indices = @transform_4, window_bounds = array<i64: 32, 128>}]} {
    %c0 = arith.constant 0 : index
    %c0_0 = arith.constant 0 : index
    %c0_1 = arith.constant 0 : index
    %0 = vector.load %arg1[%c0, %c0_0, %c0_1] : memref<3x32x72xf32, #tpu.memory_space<vmem>>, vector<1x32x72xf32>
    %1 = vector.shape_cast %0 : vector<1x32x72xf32> to vector<32x72xf32>
    %c0_2 = arith.constant 0 : index
    %c0_3 = arith.constant 0 : index
    %c0_4 = arith.constant 0 : index
    %2 = vector.load %arg2[%c0_2, %c0_3, %c0_4] : memref<3x72x128xf32, #tpu.memory_space<vmem>>, vector<1x72x128xf32>
    %3 = vector.shape_cast %2 : vector<1x72x128xf32> to vector<72x128xf32>
    %cst = arith.constant dense<0.000000e+00> : vector<32x128xf32>
    %4 = tpu.matmul %1, %3, %cst {dimension_numbers = #tpu.dot_dimension_numbers<[1], [0], [0], [1], [0, 0, 1, 1], [], []>, precision = #tpu.contract_precision<fp32>} : vector<32x72xf32>, vector<72x128xf32>, vector<32x128xf32> -> vector<32x128xf32>
    %c1 = arith.constant 1 : index
    %c0_5 = arith.constant 0 : index
    %c0_6 = arith.constant 0 : index
    %5 = vector.load %arg1[%c1, %c0_5, %c0_6] : memref<3x32x72xf32, #tpu.memory_space<vmem>>, vector<1x32x72xf32>
    %6 = vector.shape_cast %5 : vector<1x32x72xf32> to vector<32x72xf32>
    %c1_7 = arith.constant 1 : index
    %c0_8 = arith.constant 0 : index
    %c0_9 = arith.constant 0 : index
    %7 = vector.load %arg2[%c1_7, %c0_8, %c0_9] : memref<3x72x128xf32, #tpu.memory_space<vmem>>, vector<1x72x128xf32>
    %8 = vector.shape_cast %7 : vector<1x72x128xf32> to vector<72x128xf32>
    %cst_10 = arith.constant dense<0.000000e+00> : vector<32x128xf32>
    %9 = tpu.matmul %6, %8, %cst_10 {dimension_numbers = #tpu.dot_dimension_numbers<[1], [0], [0], [1], [0, 0, 1, 1], [], []>, precision = #tpu.contract_precision<fp32>} : vector<32x72xf32>, vector<72x128xf32>, vector<32x128xf32> -> vector<32x128xf32>
    %10 = arith.addf %4, %9 : vector<32x128xf32>
    %c2 = arith.constant 2 : index
    %c0_11 = arith.constant 0 : index
    %c0_12 = arith.constant 0 : index
    %11 = vector.load %arg1[%c2, %c0_11, %c0_12] : memref<3x32x72xf32, #tpu.memory_space<vmem>>, vector<1x32x72xf32>
    %12 = vector.shape_cast %11 : vector<1x32x72xf32> to vector<32x72xf32>
    %c2_13 = arith.constant 2 : index
    %c0_14 = arith.constant 0 : index
    %c0_15 = arith.constant 0 : index
    %13 = vector.load %arg2[%c2_13, %c0_14, %c0_15] : memref<3x72x128xf32, #tpu.memory_space<vmem>>, vector<1x72x128xf32>
    %14 = vector.shape_cast %13 : vector<1x72x128xf32> to vector<72x128xf32>
    %cst_16 = arith.constant dense<0.000000e+00> : vector<32x128xf32>
    %15 = tpu.matmul %12, %14, %cst_16 {dimension_numbers = #tpu.dot_dimension_numbers<[1], [0], [0], [1], [0, 0, 1, 1], [], []>, precision = #tpu.contract_precision<fp32>} : vector<32x72xf32>, vector<72x128xf32>, vector<32x128xf32> -> vector<32x128xf32>
    %16 = arith.addf %10, %15 : vector<32x128xf32>
    %cst_17 = arith.constant dense<0.000000e+00> : vector<128xf32>
    %17 = vector.multi_reduction <add>, %16, %cst_17 [0] : vector<32x128xf32> to vector<128xf32>
    %18 = vector.shape_cast %17 : vector<128xf32> to vector<1x128xf32>
    %19 = arith.mulf %16, %16 : vector<32x128xf32>
    %cst_18 = arith.constant dense<0.000000e+00> : vector<128xf32>
    %20 = vector.multi_reduction <add>, %19, %cst_18 [0] : vector<32x128xf32> to vector<128xf32>
    %21 = vector.shape_cast %20 : vector<128xf32> to vector<1x128xf32>
    %22 = tpu.concatenate %18, %21 in 0 : vector<1x128xf32>, vector<1x128xf32> -> vector<2x128xf32>
    %c8_i32 = arith.constant 8 : i32
    %23 = tpu.dynamic_rotate %22 by %c8_i32 dim 1 : vector<2x128xf32>, i32 -> vector<2x128xf32>
    %24 = arith.addf %22, %23 : vector<2x128xf32>
    %c16_i32 = arith.constant 16 : i32
    %25 = tpu.dynamic_rotate %24 by %c16_i32 dim 1 : vector<2x128xf32>, i32 -> vector<2x128xf32>
    %26 = arith.addf %24, %25 : vector<2x128xf32>
    %c32_i32 = arith.constant 32 : i32
    %27 = tpu.dynamic_rotate %26 by %c32_i32 dim 1 : vector<2x128xf32>, i32 -> vector<2x128xf32>
    %28 = arith.addf %26, %27 : vector<2x128xf32>
    %c64_i32 = arith.constant 64 : i32
    %29 = tpu.dynamic_rotate %28 by %c64_i32 dim 1 : vector<2x128xf32>, i32 -> vector<2x128xf32>
    %30 = arith.addf %28, %29 : vector<2x128xf32>
    %31 = vector.extract_strided_slice %30 {offsets = [0, 0], sizes = [1, 128], strides = [1, 1]} : vector<2x128xf32> to vector<1x128xf32>
    %cst_19 = arith.constant 0.001953125 : f32
    %32 = vector.broadcast %cst_19 : f32 to vector<1x128xf32>
    %33 = arith.mulf %31, %32 : vector<1x128xf32>
    %34 = vector.extract_strided_slice %30 {offsets = [1, 0], sizes = [1, 128], strides = [1, 1]} : vector<2x128xf32> to vector<1x128xf32>
    %cst_20 = arith.constant 0.001953125 : f32
    %35 = vector.broadcast %cst_20 : f32 to vector<1x128xf32>
    %36 = arith.mulf %34, %35 : vector<1x128xf32>
    %37 = arith.mulf %33, %33 : vector<1x128xf32>
    %38 = arith.subf %36, %37 : vector<1x128xf32>
    %cst_21 = arith.constant 0.000000e+00 : f32
    %39 = vector.broadcast %cst_21 : f32 to vector<1x128xf32>
    %40 = arith.maximumf %38, %39 : vector<1x128xf32>
    %c0_22 = arith.constant 0 : index
    %c0_23 = arith.constant 0 : index
    %41 = vector.load %arg3[%c0_22, %c0_23] : memref<1x128xf32, #tpu.memory_space<vmem>>, vector<1x128xf32>
    %cst_24 = arith.constant 9.99999974E-6 : f32
    %42 = vector.broadcast %cst_24 : f32 to vector<1x128xf32>
    %43 = arith.addf %40, %42 : vector<1x128xf32>
    %44 = math.rsqrt %43 : vector<1x128xf32>
    %45 = arith.mulf %41, %44 : vector<1x128xf32>
    %c0_25 = arith.constant 0 : index
    %c0_26 = arith.constant 0 : index
    %46 = vector.load %arg4[%c0_25, %c0_26] : memref<1x128xf32, #tpu.memory_space<vmem>>, vector<1x128xf32>
    %47 = arith.mulf %33, %45 : vector<1x128xf32>
    %48 = arith.subf %46, %47 : vector<1x128xf32>
    %49 = vector.broadcast %45 : vector<1x128xf32> to vector<32x128xf32>
    %50 = arith.mulf %16, %49 : vector<32x128xf32>
    %51 = vector.broadcast %48 : vector<1x128xf32> to vector<32x128xf32>
    %52 = arith.addf %50, %51 : vector<32x128xf32>
    %cst_27 = arith.constant 0.000000e+00 : f32
    %53 = vector.broadcast %cst_27 : f32 to vector<32x128xf32>
    %54 = arith.maximumf %52, %53 : vector<32x128xf32>
    %c0_28 = arith.constant 0 : index
    %c0_29 = arith.constant 0 : index
    %55 = vector.load %arg5[%c0_28, %c0_29] : memref<32x128xf32, #tpu.memory_space<vmem>>, vector<32x128xf32>
    tpu.vector_store %arg5[%c0_28, %c0_29], %54 {strides = array<i32>} : memref<32x128xf32, #tpu.memory_space<vmem>>, vector<32x128xf32>,
    return
  }
  func.func @transform_0(%arg0: i32) -> (i32, i32, i32) {
    %c0_i32 = arith.constant 0 : i32
    %c0_i32_0 = arith.constant 0 : i32
    %c0_i32_1 = arith.constant 0 : i32
    %c0_i32_2 = arith.constant 0 : i32
    return %c0_i32, %c0_i32_0, %c0_i32_1 : i32, i32, i32
  }
  func.func @transform_1(%arg0: i32) -> (i32, i32, i32) {
    %c0_i32 = arith.constant 0 : i32
    %c0_i32_0 = arith.constant 0 : i32
    %c0_i32_1 = arith.constant 0 : i32
    %c0_i32_2 = arith.constant 0 : i32
    return %c0_i32, %c0_i32_0, %c0_i32_1 : i32, i32, i32
  }
  func.func @transform_2(%arg0: i32) -> (i32, i32) {
    %c0_i32 = arith.constant 0 : i32
    %c0_i32_0 = arith.constant 0 : i32
    %c0_i32_1 = arith.constant 0 : i32
    return %c0_i32, %c0_i32_0 : i32, i32
  }
  func.func @transform_3(%arg0: i32) -> (i32, i32) {
    %c0_i32 = arith.constant 0 : i32
    %c0_i32_0 = arith.constant 0 : i32
    %c0_i32_1 = arith.constant 0 : i32
    return %c0_i32, %c0_i32_0 : i32, i32
  }
  func.func @transform_4(%arg0: i32) -> (i32, i32) {
    %c0_i32 = arith.constant 0 : i32
    %c0_i32_0 = arith.constant 0 : i32
    %c0_i32_1 = arith.constant 0 : i32
    return %c0_i32, %c0_i32_0 : i32, i32
  }
}

</mosaic_0001>

<bundles_post_ra>
// kernel: tile.13
= control target key start
LH: loop header
LB: loop body
LE: loop exit
PB: predicated region body
PF: predicated region fallthrough
CT: control target
= control target key end

     0   :  { %s28_s0 = inlined_call_operand.vmem [shape: f32[8], index: 0, kind: input, shape index: {}]   ;;  %s29_s1 = inlined_call_operand.vmem [shape: f32[16,8], index: 1, kind: output, shape index: {}]  }
   0x1   :  { %v4_v0 = vld [vmem:[%s28_s0] ss:$0 sm:$0xff] }
   0x2   :  { %5 = vst [vmem:[%s29_s1] sm:$0xff] %v4_v0  ;;  %8 = vst [vmem:[%s29_s1 + $0x8] sm:$0xff] %v4_v0 }

// kernel: tile.14
= control target key start
LH: loop header
LB: loop body
LE: loop exit
PB: predicated region body
PF: predicated region fallthrough
CT: control target
= control target key end

     0   :  { %s131_s10 = smov 120   ;;  %s132_s11 = smov 104   ;;  %vm3_vm0 = vcmask 64512   ;;  %vm9_vm1 = vcmask 1048512   ;;  %vm15_vm2 = vcmask 982912   ;;  %vm21_vm3 = vcmask 917312   ;;  %s207_s0 = inlined_call_operand.vmem [shape: f32[16,8], index: 0, kind: input, shape index: {}]   ;;  %s208_s1 = inlined_call_operand.vmem [shape: f32[1,128], index: 1, kind: output, shape index: {}]  }
   0x1   :  { %v101_v0 = vld [vmem:[%s207_s0 + $0xf] sm:$0x1]   ;;  %v103_v1 = vld [vmem:[%s207_s0 + $0xd] sm:$0x1]   ;;  %v102_v2 = vld [vmem:[%s207_s0 + $0xe] sm:$0x1]  }
   0x2   :  { %7 = vrot.lane.b32.xlu0 %v101_v0, %s131_s10  ;;  %19 = vrot.lane.b32.xlu1 %v103_v1, %s132_s11  ;;  %v104_v3 = vld [vmem:[%s207_s0 + $0xc] sm:$0x1]   ;;  %s133_s16 = smov 112   ;;  %s134_s17 = smov 96   ;;  %v105_v4 = vld [vmem:[%s207_s0 + $0xb] sm:$0x1]  }
   0x3   :  { %v106_v5 = vld [vmem:[%s207_s0 + $0xa] sm:$0x1]   ;;  %v2_v6 = vld [vmem:[%s207_s0] sm:$0x1]   ;;  %s135_s24 = smov 88   ;;  %s136_s25 = smov 80  }
   0x4   :  { %4 = vst.msk [vmem:[#allocation0] sm:$0x1] %vm3_vm0, %v2_v6   ;;  %v107_v7 = vld [vmem:[%s207_s0 + $0x9] sm:$0x1]   ;;  %v108_v8 = vld [vmem:[%s207_s0 + $0x8] sm:$0x1]  }
   0x5   :  { %s137_s30 = smov 72   ;;  %s138_s2 = smov 64   ;;  %v109_v9 = vld [vmem:[%s207_s0 + $0x7] sm:$0x1]   ;;  %v110_v10 = vld [vmem:[%s207_s0 + $0x6] sm:$0x1]  }
   0x6   :  { %13 = vrot.lane.b32.xlu0 %v102_v2, %s133_s16  ;;  %25 = vrot.lane.b32.xlu1 %v104_v3, %s134_s17  ;;  %s139_s7 = smov 56   ;;  %s140_s8 = smov 48   ;;  %v111_v11 = vld [vmem:[%s207_s0 + $0x5] sm:$0x1]   ;;  %v112_v12 = vld [vmem:[%s207_s0 + $0x4] sm:$0x1]  }
   0x7   :  { %s141_s13 = smov 40   ;;  %s142_s14 = smov 32   ;;  %v113_v13 = vld [vmem:[%s207_s0 + $0x3] sm:$0x1]   ;;  %v114_v14 = vld [vmem:[%s207_s0 + $0x2] sm:$0x1]  }
   0x8   :  { %s143_s19 = smov 24   ;;  %s144_s20 = smov 16   ;;  %v115_v15 = vld [vmem:[%s207_s0 + $0x1] sm:$0x1]   ;;  %vm27_vm4 = vcmask 851712   ;;  %vm33_vm5 = vcmask 786112  }
   0x9   :  { %s145_s0 = smov 8   ;;  %vm39_vm6 = vcmask 720512   ;;  %vm45_vm7 = vcmask 654912   ;;  %vm51_vm8 = vcmask 589312   ;;  %vm57_vm9 = vcmask 523712  }
   0xa   :  { %31 = vrot.lane.b32.xlu0 %v105_v4, %s135_s24  ;;  %37 = vrot.lane.b32.xlu1 %v106_v5, %s136_s25  ;;  %vm63_vm10 = vcmask 458112   ;;  %vm69_vm11 = vcmask 392512   ;;  %vm75_vm12 = vcmask 326912   ;;  %vm81_vm13 = vcmask 261312  }
   0xb   :  { %vm87_vm14 = vcmask 195712   ;;  %vm93_vm15 = vcmask 130112  }
   0xe   :  { %43 = vrot.lane.b32.xlu0 %v107_v7, %s137_s30  ;;  %49 = vrot.lane.b32.xlu1 %v108_v8, %s138_s2 }
  0x12   :  { %55 = vrot.lane.b32.xlu0 %v109_v9, %s139_s7  ;;  %61 = vrot.lane.b32.xlu1 %v110_v10, %s140_s8 }
  0x16   :  { %67 = vrot.lane.b32.xlu0 %v111_v11, %s141_s13  ;;  %73 = vrot.lane.b32.xlu1 %v112_v12, %s142_s14 }
  0x1a   :  { %79 = vrot.lane.b32.xlu0 %v113_v13, %s143_s19  ;;  %85 = vrot.lane.b32.xlu1 %v114_v14, %s144_s20 }
  0x1e   :  { %91 = vrot.lane.b32.xlu0 %v115_v15, %s145_s0 }
  0x74   :  { %v8_v16 = vpop.permute.xlu0 %7   ;;  %v20_v17 = vpop.permute.xlu1 %19  }
  0x75   :  { %10 = vst.msk [vmem:[#allocation0] sm:$0x1] %vm9_vm1, %v8_v16  }
  0x78   :  { %v14_v18 = vpop.permute.xlu0 %13   ;;  %v26_v19 = vpop.permute.xlu1 %25  }
  0x79   :  { %16 = vst.msk [vmem:[#allocation0] sm:$0x1] %vm15_vm2, %v14_v18  }
  0x7a   :  { %22 = vst.msk [vmem:[#allocation0] sm:$0x1] %vm21_vm3, %v20_v17  }
  0x7b   :  { %28 = vst.msk [vmem:[#allocation0] sm:$0x1] %vm27_vm4, %v26_v19  }
  0x7c   :  { %v32_v20 = vpop.permute.xlu0 %31   ;;  %v38_v21 = vpop.permute.xlu1 %37  }
  0x7d   :  { %34 = vst.msk [vmem:[#allocation0] sm:$0x1] %vm33_vm5, %v32_v20  }
  0x7e   :  { %40 = vst.msk [vmem:[#allocation0] sm:$0x1] %vm39_vm6, %v38_v21  }
  0x80   :  { %v44_v22 = vpop.permute.xlu0 %43   ;;  %v50_v23 = vpop.permute.xlu1 %49  }
  0x81   :  { %46 = vst.msk [vmem:[#allocation0] sm:$0x1] %vm45_vm7, %v44_v22  }
  0x82   :  { %52 = vst.msk [vmem:[#allocation0] sm:$0x1] %vm51_vm8, %v50_v23  }
  0x84   :  { %v56_v24 = vpop.permute.xlu0 %55   ;;  %v62_v25 = vpop.permute.xlu1 %61  }
  0x85   :  { %58 = vst.msk [vmem:[#allocation0] sm:$0x1] %vm57_vm9, %v56_v24  }
  0x86   :  { %64 = vst.msk [vmem:[#allocation0] sm:$0x1] %vm63_vm10, %v62_v25  }
  0x88   :  { %v68_v26 = vpop.permute.xlu0 %67   ;;  %v74_v27 = vpop.permute.xlu1 %73  }
  0x89   :  { %70 = vst.msk [vmem:[#allocation0] sm:$0x1] %vm69_vm11, %v68_v26  }
  0x8a   :  { %76 = vst.msk [vmem:[#allocation0] sm:$0x1] %vm75_vm12, %v74_v27  }
  0x8c   :  { %v80_v28 = vpop.permute.xlu0 %79   ;;  %v86_v29 = vpop.permute.xlu1 %85  }
  0x8d   :  { %82 = vst.msk [vmem:[#allocation0] sm:$0x1] %vm81_vm13, %v80_v28  }
  0x8e   :  { %88 = vst.msk [vmem:[#allocation0] sm:$0x1] %vm87_vm14, %v86_v29  }
  0x90   :  { %v92_v30 = vpop.permute.xlu0 %91  }
  0x91   :  { %94 = vst.msk [vmem:[#allocation0] sm:$0x1] %vm93_vm15, %v92_v30  }
  0x98   :  { %v98_v31 = vld [vmem:[#allocation0] sm:$0x1] }
  0x99   :  { %100 = vst [vmem:[%s208_s1] sm:$0x1] %v98_v31 }

// kernel: conv_batch_norm.1
= control target key start
LH: loop header
LB: loop body
LE: loop exit
PB: predicated region body
PF: predicated region fallthrough
CT: control target
= control target key end

     0   :  { %vm45_vm0 = vcmask 588800   ;;  %vm2160_vm1 = vcmask 1040384   ;;  %s3293_s14 = smov 16   ;;  %s3294_s15 = smov 32   ;;  %s4213_s1 = inlined_call_operand.vmem [shape: f32[3,72,128], index: 1, kind: input, shape index: {}]   ;;  %s4214_s0 = inlined_call_operand.vmem [shape: f32[3,32,72], index: 0, kind: input, shape index: {}]   ;;  %s4215_s2 = inlined_call_operand.vmem [shape: f32[1,128], index: 2, kind: input, shape index: {}]   ;;  %s4216_s3 = inlined_call_operand.vmem [shape: f32[1,128], index: 3, kind: input, shape index: {}]   ;;  %s4217_s4 = inlined_call_operand.vmem [shape: f32[32,128], index: 4, kind: output, shape index: {}]  }
   0x1   :  { %v2241_v0 = vld [vmem:[%s4213_s1 + $0x48] sm:$0xff]  ;;  %v2242_v1 = vld [vmem:[%s4213_s1 + $0x50] sm:$0xff]  ;;  %v21_v2 = vld [vmem:[%s4213_s1] sm:$0xff]  ;;  %s3295_s16 = smov 64  }
   0x2   :  { %v59_v3 = vand.u32 4294901760, %v2241_v0  ;;  %v62_v4 = vand.u32 4294901760, %v2242_v1  ;;  %v22_v5 = vld [vmem:[%s4213_s1 + $0x8] sm:$0xff]  ;;  %v750_v6 = vand.u32 4294901760, %v21_v2  ;;  %v3337_v7 = vld [vmem:[%s4213_s1 + $0x58] sm:$0xff]  ;;  %v3342_v8 = vld [vmem:[%s4213_s1 + $0x60] sm:$0xff] }
   0x3   :  { %v753_v9 = vand.u32 4294901760, %v22_v5  ;;  %v65_v10 = vand.u32 4294901760, %v3337_v7  ;;  %v68_v11 = vand.u32 4294901760, %v3342_v8  ;;  %v3349_v12 = vld [vmem:[%s4213_s1 + $0x10] sm:$0xff]  ;;  %v3354_v13 = vld [vmem:[%s4213_s1 + $0x18] sm:$0xff]  ;;  %v3359_v14 = vld [vmem:[%s4213_s1 + $0x68] sm:$0xff] }
   0x4   :  { %v3361_v15 = vpack.c.bf16 %v62_v4, %v59_v3  ;;  %v756_v16 = vand.u32 4294901760, %v3349_v12  ;;  %v759_v17 = vand.u32 4294901760, %v3354_v13  ;;  %v3368_v18 = vld [vmem:[%s4213_s1 + $0x70] sm:$0xff]  ;;  %v71_v19 = vand.u32 4294901760, %v3359_v14  ;;  %v3374_v20 = vld [vmem:[%s4213_s1 + $0x20] sm:$0xff]  ;;  %v3379_v21 = vld [vmem:[%s4213_s1 + $0x28] sm:$0xff] }
   0x5   :  { %v3381_v22 = vpack.c.bf16 %v753_v9, %v750_v6  ;;  %v3387_v23 = vpack.c.bf16 %v68_v11, %v65_v10  ;;  %v74_v24 = vand.u32 4294901760, %v3368_v18  ;;  %v762_v25 = vand.u32 4294901760, %v3374_v20  ;;  %v3394_v26 = vld [vmem:[%s4213_s1 + $0x78] sm:$0xff]  ;;  %v3399_v27 = vld [vmem:[%s4213_s1 + $0x80] sm:$0xff]  ;;  %v3404_v28 = vld [vmem:[%s4213_s1 + $0x30] sm:$0xff] }
   0x6   :  { %2930 = vmatprep.subr.bf16.mxu1 %v3361_v15  ;;  %v3411_v29 = vpack.c.bf16 %v759_v17, %v756_v16  ;;  %v765_v30 = vand.u32 4294901760, %v3379_v21  ;;  %v77_v31 = vand.u32 4294901760, %v3394_v26  ;;  %v80_v32 = vand.u32 4294901760, %v3399_v27  ;;  %v3419_v33 = vld [vmem:[%s4213_s1 + $0x38] sm:$0xff]  ;;  %v2237_v36 = vld [vmem:[%s4214_s0 + $0x20] sm:$0xff]  ;;  %v2238_v38 = vld [vmem:[%s4214_s0 + $0x28] sm:$0xff] }
   0x7   :  { %4278 = vst [vmem:[#allocation2_spill] sm:$0xff] %v3381_v22  ;;  %3074 = vmatprep.subr.bf16.mxu0 %v3381_v22  ;;  %2932 = vmatpush3.bf16.msra.mxu1 %v3361_v15  ;;  %v768_v34 = vand.u32 4294901760, %v3404_v28  ;;  %v771_v35 = vand.u32 4294901760, %v3419_v33  ;;  %v17_v37 = vld [vmem:[%s4214_s0] sm:$0xff]  ;;  %v3440_v39 = vpack.c.bf16 %v74_v24, %v71_v19  ;;  %v47_v42 = vsel %vm45_vm0, %v2237_v36, 0  ;;  %v18_v47 = vld [vmem:[%s4214_s0 + $0x8] sm:$0xff] }
   0x8   :  { %4279 = vst [vmem:[#allocation3_spill] sm:$0xff] %v3411_v29  ;;  %3076 = vmatpush3.bf16.msra.mxu0 %v3381_v22  ;;  %2934 = vmatprep.subr.bf16.mxu1 %v3387_v23  ;;  %v3446_v40 = vpack.c.bf16 %v765_v30, %v762_v25  ;;  %v3452_v41 = vpack.c.bf16 %v80_v32, %v77_v31  ;;  %v3462_v44 = vand.u32 4294901760, %v47_v42  ;;  %v738_v48 = vsel %vm45_vm0, %v17_v37, 0  ;;  %v3490_v56 = vld [vmem:[%s4213_s1 + $0x88] sm:$0xff] }
   0x9   :  { %3078 = vmatprep.subr.bf16.mxu0 %v3411_v29  ;;  %v3460_v43 = vpack.c.bf16 %v771_v35, %v768_v34  ;;  %v3464_v45 = vsub.f32 %v2241_v0, %v59_v3  ;;  %v3466_v46 = vsub.f32 %v2242_v1, %v62_v4  ;;  %v3472_v49 = vsub.f32 %v21_v2, %v750_v6  ;;  %v3511_v1 = vld [vmem:[%s4213_s1 + $0x40] sm:$0xff] }
   0xa   :  { %4280 = vst [vmem:[#allocation4_spill] sm:$0xff] %v3446_v40  ;;  %v3474_v50 = vsub.f32 %v22_v5, %v753_v9  ;;  %v50_v51 = vsel %vm45_vm0, %v2238_v38, 0  ;;  %v3479_v52 = vsub.f32 %v47_v42, %v3462_v44  ;;  %v3483_v55 = vand.u32 4294901760, %v738_v48 }
   0xb   :  { %4281 = vst [vmem:[#allocation5_spill] sm:$0xff] %v3460_v43  ;;  %2936 = vmatpush3.bf16.msra.mxu1 %v3387_v23  ;;  %v4227_v53 = vand.u32 4294901760, %v3464_v45  ;;  %v4226_v54 = vand.u32 4294901760, %v3466_v46  ;;  %v866_v57 = vand.u32 4294901760, %v3472_v49  ;;  %v3494_v59 = vand.u32 4294901760, %v50_v51 }
   0xc   :  { %4282 = vst [vmem:[#allocation6_spill] sm:$0xff] %v3483_v55  ;;  %3080 = vmatpush3.bf16.msra.mxu0 %v3411_v29  ;;  %2938 = vmatprep.subr.bf16.mxu1 %v3440_v39  ;;  %v4240_v58 = vand.u32 4294901760, %v3474_v50  ;;  %v741_v60 = vsel %vm45_vm0, %v18_v47, 0  ;;  %v4228_v61 = vand.u32 4294901760, %v3479_v52  ;;  %v3506_v0 = vsub.f32 %v738_v48, %v3483_v55 }
   0xd   :  { %3082 = vmatprep.subr.bf16.mxu0 %v3446_v40  ;;  %v176_v62 = vsub.f32 %v3464_v45, %v4227_v53  ;;  %v183_v63 = vsub.f32 %v3466_v46, %v4226_v54  ;;  %v3514_v2 = vsub.f32 %v50_v51, %v3494_v59  ;;  %v3516_v3 = vand.u32 4294901760, %v741_v60 }
   0xe   :  { %4283 = vst [vmem:[#allocation7_spill] sm:$0xff] %v3506_v0  ;;  %v3521_v4 = vsub.f32 %v3337_v7, %v65_v10  ;;  %v3525_v5 = vand.u32 4294901760, %v3490_v56  ;;  %v135_v6 = vsub.f32 %v3479_v52, %v4228_v61  ;;  %v4218_v36 = vand.u32 4294901760, %v3506_v0 }
   0xf   :  { %2940 = vmatpush3.bf16.msra.mxu1 %v3440_v39  ;;  %v177_v9 = vand.u32 4294901760, %v176_v62  ;;  %v184_v37 = vand.u32 4294901760, %v183_v63  ;;  %v4219_v7 = vand.u32 4294901760, %v3514_v2  ;;  %v3538_v38 = vsub.f32 %v3342_v8, %v68_v11 }
  0x10   :  { %3084 = vmatpush3.bf16.msra.mxu0 %v3446_v40  ;;  %2942 = vmatprep.subr.bf16.mxu1 %v3452_v41  ;;  %v4223_v10 = vand.u32 4294901760, %v3521_v4  ;;  %v3542_v42 = vand.u32 4294901760, %v3511_v1  ;;  %v136_v47 = vand.u32 4294901760, %v135_v6  ;;  %v3089_v48 = vpack.c.bf16 %v4240_v58, %v866_v57 }
  0x11   :  { %3086 = vmatprep.subr.bf16.mxu0 %v3460_v43  ;;  %2731 = vmatprep.mubr.f32.mxu0 %v4218_v36  ;;  %v3553_v51 = vsub.f32 %v3349_v12, %v756_v16  ;;  %v145_v8 = vsub.f32 %v3514_v2, %v4219_v7  ;;  %v3559_v11 = vsub.f32 %v741_v60, %v3516_v3  ;;  %v4222_v63 = vand.u32 4294901760, %v3538_v38 }
  0x12   :  { %4284 = vst [vmem:[#allocation8_spill] sm:$0xff] %v3542_v42  ;;  %v190_v62 = vsub.f32 %v3521_v4, %v4223_v10  ;;  %2515 = vmatprep.mubr.f32.mxu1 %v136_v47  ;;  %v3570_v12 = vsub.f32 %v3354_v13, %v759_v17  ;;  %v3575_v16 = vsub.f32 %v3359_v14, %v71_v19 }
  0x13   :  { %4285 = vst [vmem:[#allocation9_spill] sm:$0xff] %v3559_v11  ;;  %2944 = vmatpush3.bf16.msra.mxu1 %v3452_v41  ;;  %v4239_v6 = vand.u32 4294901760, %v3553_v51  ;;  %v3580_v60 = vsub.f32 %v3368_v18, %v74_v24  ;;  %v2945_v47 = vpack.c.bf16 %v184_v37, %v177_v9  ;;  %v146_v36 = vand.u32 4294901760, %v145_v8 }
  0x14   :  { %3088 = vmatpush3.bf16.msra.mxu0 %v3460_v43  ;;  %2513 = vmatprep.subr.mxu1 %v3525_v5  ;;  %v191_v7 = vand.u32 4294901760, %v190_v62  ;;  %v197_v13 = vsub.f32 %v3538_v38, %v4222_v63  ;;  %v4238_v14 = vand.u32 4294901760, %v3570_v12  ;;  %v4220_v17 = vand.u32 4294901760, %v3575_v16 }
  0x15   :  { %2729 = vmatprep.subr.mxu0 %v3542_v42  ;;  %v4221_v18 = vand.u32 4294901760, %v3580_v60  ;;  %v3594_v19 = vsub.f32 %v3374_v20, %v762_v25  ;;  %v4224_v24 = vand.u32 4294901760, %v3559_v11  ;;  %v3600_v37 = vsub.f32 %v3379_v21, %v765_v30 }
  0x16   :  { %v198_v9 = vand.u32 4294901760, %v197_v13  ;;  %v3605_v8 = vsub.f32 %v3394_v26, %v77_v31  ;;  %v3093_v20 = vpack.c.bf16 %v4238_v14, %v4239_v6  ;;  %v204_v25 = vsub.f32 %v3575_v16, %v4220_v17  ;;  %v2239_v26 = vld [vmem:[%s4214_s0 + $0x30] sm:$0xff]  ;;  %v3792_v14 = vld [vmem:[%s4213_s1 + $0xb8] sm:$0xff] }
  0x17   :  { %2514 = vmatpush3.msra.mxu1 %v3525_v5  ;;  %v211_v21 = vsub.f32 %v3580_v60, %v4221_v18  ;;  %v4237_v30 = vand.u32 4294901760, %v3594_v19  ;;  %v4236_v62 = vand.u32 4294901760, %v3600_v37  ;;  %v3628_v17 = vsub.f32 %v3399_v27, %v80_v32  ;;  %v2240_v27 = vld [vmem:[%s4214_s0 + $0x38] sm:$0xff] }
  0x18   :  { %2730 = vmatpush3.msra.mxu0 %v3542_v42  ;;  %2946 = vmatprep.subr.bf16.mxu1 %v2945_v47  ;;  %v2949_v31 = vpack.c.bf16 %v198_v9, %v191_v7  ;;  %v4225_v13 = vand.u32 4294901760, %v3605_v8  ;;  %v205_v18 = vand.u32 4294901760, %v204_v25  ;;  %v3633_v10 = vsub.f32 %v3404_v28, %v768_v34  ;;  %v19_v9 = vld [vmem:[%s4214_s0 + $0x10] sm:$0xff] }
  0x19   :  { %3090 = vmatprep.subr.bf16.mxu0 %v3089_v48  ;;  %2516 = vmatmul.mubr.f32.vlgmr.msra.gmra.mrb[0].mxu1 %v146_v36  ;;  %v212_v63 = vand.u32 4294901760, %v211_v21  ;;  %v3638_v7 = vsub.f32 %v3419_v33, %v771_v35  ;;  %v3097_v28 = vpack.c.bf16 %v4236_v62, %v4237_v30  ;;  %v4229_v33 = vand.u32 4294901760, %v3628_v17  ;;  %v20_v21 = vld [vmem:[%s4214_s0 + $0x18] sm:$0xff]  ;;  %v3787_v30 = vld [vmem:[%s4213_s1 + $0xb0] sm:$0xff] }
  0x1a   :  { %2948 = vmatpush3.bf16.msra.mxu1 %v2945_v47  ;;  %2732 = vmatmul.mubr.f32.vlgmr.msra.gmra.mrb[0].mxu0 %v4224_v24  ;;  %v218_v32 = vsub.f32 %v3605_v8, %v4225_v13  ;;  %v53_v34 = vsel %vm45_vm0, %v2239_v26, 0  ;;  %v4232_v36 = vand.u32 4294901760, %v3633_v10  ;;  %v747_v61 = vsel %vm45_vm0, %v20_v21, 0 }
  0x1b   :  { %3092 = vmatpush3.bf16.msra.mxu0 %v3089_v48  ;;  %2950 = vmatprep.subr.bf16.mxu1 %v2949_v31  ;;  %v2953_v35 = vpack.c.bf16 %v212_v63, %v205_v18  ;;  %v4230_v47 = vand.u32 4294901760, %v3638_v7  ;;  %v3659_v25 = vand.u32 4294901760, %v53_v34  ;;  %v225_v13 = vsub.f32 %v3628_v17, %v4229_v33 }
  0x1c   :  { %3094 = vmatprep.subr.bf16.mxu0 %v3093_v20  ;;  %v219_v24 = vand.u32 4294901760, %v218_v32  ;;  %v744_v48 = vsel %vm45_vm0, %v19_v9, 0  ;;  %v56_v63 = vsel %vm45_vm0, %v2240_v27, 0  ;;  %v3679_v32 = vsub.f32 %v3490_v56, %v3525_v5 }
  0x1d   :  { %4286 = vst [vmem:[#allocation10_spill] sm:$0xff] %v3659_v25  ;;  %v3670_v18 = vsub.f32 %v53_v34, %v3659_v25  ;;  %v3672_v26 = vand.u32 4294901760, %v744_v48  ;;  %v3674_v54 = vand.u32 4294901760, %v56_v63  ;;  %v226_v53 = vand.u32 4294901760, %v225_v13 }
  0x1e   :  { %2952 = vmatpush3.bf16.msra.mxu1 %v2949_v31  ;;  %v3688_v33 = vand.u32 4294901760, %v747_v61  ;;  %v3101_v56 = vpack.c.bf16 %v4230_v47, %v4232_v36  ;;  %v3699_v13 = vsub.f32 %v3511_v1, %v3542_v42  ;;  %v4295_v11 = vand.u32 4294901760, %v3553_v51 }
  0x1f   :  { %4287 = vst [vmem:[#allocation11_spill] sm:$0xff] %v3672_v26  ;;  %4288 = vst [vmem:[#allocation12_spill] sm:$0xff] %v3674_v54  ;;  %3096 = vmatpush3.bf16.msra.mxu0 %v3093_v20  ;;  %2954 = vmatprep.subr.bf16.mxu1 %v2953_v35  ;;  %v4231_v9 = vand.u32 4294901760, %v3670_v18  ;;  %v3683_v27 = vsub.f32 %v744_v48, %v3672_v26  ;;  %v3686_v34 = vsub.f32 %v56_v63, %v3674_v54 }
  0x20   :  { %4290 = vst [vmem:[#allocation14_spill] sm:$0xff] %v3688_v33  ;;  %3098 = vmatprep.subr.bf16.mxu0 %v3097_v28  ;;  %v2957_v31 = vpack.c.bf16 %v226_v53, %v219_v24  ;;  %v3695_v20 = vand.u32 4294901760, %v3679_v32  ;;  %4291 = vst [vmem:[#allocation15_spill] sm:$0xff] %v3699_v13  ;;  %v3707_v24 = vsub.f32 %v747_v61, %v3688_v33  ;;  %v3718_v61 = vand.u32 4294901760, %v3699_v13 }
  0x21   :  { %4289 = vst [vmem:[#allocation13_spill] sm:$0xff] %v3683_v27  ;;  %v155_v21 = vsub.f32 %v3670_v18, %v4231_v9  ;;  %v4234_v48 = vand.u32 4294901760, %v3683_v27  ;;  %v4235_v53 = vand.u32 4294901760, %v3686_v34  ;;  %v4294_v13 = vand.u32 4294901760, %v3474_v50  ;;  %v3834_v27 = vld [vmem:[%s4213_s1 + $0xc0] sm:$0xff] }
  0x22   :  { %4292 = vst [vmem:[#allocation16_spill] sm:$0xff] %v3707_v24  ;;  %2956 = vmatpush3.bf16.msra.mxu1 %v2953_v35  ;;  %v232_v63 = vsub.f32 %v3679_v32, %v3695_v20  ;;  %v4233_v9 = vand.u32 4294901760, %v3707_v24  ;;  %4293 = vst [vmem:[#allocation17_spill] sm:$0xff] %v3718_v61 }
  0x23   :  { %3100 = vmatpush3.bf16.msra.mxu0 %v3097_v28  ;;  %2958 = vmatprep.subr.bf16.mxu1 %v2957_v31  ;;  %v156_v47 = vand.u32 4294901760, %v155_v21  ;;  %v165_v1 = vsub.f32 %v3686_v34, %v4235_v53  ;;  %v2251_v28 = vld [vmem:[%s4214_s0 + $0x48] sm:$0xff]  ;;  %v2961_v21 = vpack.c.bf16 %v3466_v46, %v3464_v45 }
  0x24   :  { %3102 = vmatprep.subr.bf16.mxu0 %v3101_v56  ;;  %2734 = vmatprep.mubr.f32.mxu0 %v4234_v48  ;;  %v233_v36 = vand.u32 4294901760, %v232_v63  ;;  %v2965_v63 = vpack.c.bf16 %v3538_v38, %v3521_v4 }
  0x25   :  { %2518 = vmatprep.mubr.f32.mxu1 %v156_v47  ;;  %v166_v35 = vand.u32 4294901760, %v165_v1  ;;  %2735 = vmatmul.mubr.f32.gmra.mrb[2].mxu0 %v4233_v9  ;;  %v3730_v47 = vsel %vm45_vm0, %v2251_v28, 0  ;;  %v2253_v1 = vld [vmem:[%s4214_s0 + $0x58] sm:$0xff]  ;;  %v2973_v28 = vpack.c.bf16 %v3628_v17, %v3605_v8 }
  0x26   :  { %2960 = vmatpush3.bf16.msra.mxu1 %v2957_v31  ;;  %2755 = vmatprep.mubr.f32.mxu0 %v3483_v55  ;;  %v2250_v31 = vld [vmem:[%s4214_s0 + $0x40] sm:$0xff]  ;;  %v3764_v9 = vsel %vm45_vm0, %v2253_v1, 0  ;;  %v2257_v1 = vld [vmem:[%s4213_s1 + $0xa8] sm:$0xff] }
  0x27   :  { %3104 = vmatpush3.bf16.msra.mxu0 %v3101_v56  ;;  %2519 = vmatmul.mubr.f32.gmra.mrb[2].mxu1 %v166_v35  ;;  %v2252_v56 = vld [vmem:[%s4214_s0 + $0x50] sm:$0xff]  ;;  %v1444_v35 = vsel %vm45_vm0, %v2250_v31, 0  ;;  %v2255_v31 = vld [vmem:[%s4213_s1 + $0x98] sm:$0xff]  ;;  %v1465_v58 = vand.u32 4294901760, %v2257_v1 }
  0x28   :  { %2537 = vmatprep.subr.mxu1 %v233_v36  ;;  %2753 = vmatprep.subr.mxu0 %v3718_v61  ;;  %v3774_v48 = vand.u32 4294901760, %v1444_v35  ;;  %v1459_v62 = vand.u32 4294901760, %v2255_v31 }
  0x29   :  { %2539 = vmatprep.mubr.f32.mxu1 %v3462_v44 }
  0x2a   :  { %2538 = vmatpush3.msra.mxu1 %v233_v36  ;;  %v2969_v36 = vpack.c.bf16 %v3580_v60, %v3575_v16 }
  0x2b   :  { %2754 = vmatpush3.msra.mxu0 %v3718_v61  ;;  %2962 = vmatprep.subr.bf16.mxu1 %v2961_v21  ;;  %v874_v61 = vsub.f32 %v3474_v50, %v4294_v13 }
  0x2c   :  { %3106 = vmatprep.subr.bf16.mxu0 %v3381_v22  ;;  %2540 = vmatmul.mubr.f32.vlgmr.msra.gmra.mrb[0].mxu1 %v3494_v59 }
  0x2d   :  { %2964 = vmatpush3.bf16.msra.mxu1 %v2961_v21  ;;  %2756 = vmatmul.mubr.f32.vlgmr.msra.gmra.mrb[0].mxu0 %v3516_v3  ;;  %v3761_v21 = vsel %vm45_vm0, %v2252_v56, 0  ;;  %v2256_v56 = vld [vmem:[%s4213_s1 + $0xa0] sm:$0xff] }
  0x2e   :  { %3108 = vmatpush3.bf16.msra.mxu0 %v3381_v22  ;;  %2966 = vmatprep.subr.bf16.mxu1 %v2965_v63  ;;  %v1462_v6 = vand.u32 4294901760, %v2256_v56  ;;  %v4296_v22 = vand.u32 4294901760, %v3570_v12 }
  0x2f   :  { %3110 = vmatprep.subr.bf16.mxu0 %v3411_v29  ;;  %2542 = vmatprep.mubr.f32.mxu1 %v3659_v25 }
  0x30   :  { %2758 = vmatprep.mubr.f32.mxu0 %v3672_v26  ;;  %2543 = vmatmul.mubr.f32.gmra.mrb[2].mxu1 %v3674_v54  ;;  %v888_v13 = vsub.f32 %v3570_v12, %v4296_v22  ;;  %v4298_v54 = vand.u32 4294901760, %v3594_v19 }
  0x31   :  { %2968 = vmatpush3.bf16.msra.mxu1 %v2965_v63  ;;  %2759 = vmatmul.mubr.f32.gmra.mrb[2].mxu0 %v3688_v33  ;;  %v2254_v63 = vld [vmem:[%s4213_s1 + $0x90] sm:$0xff] }
  0x32   :  { %3112 = vmatpush3.bf16.msra.mxu0 %v3411_v29  ;;  %2970 = vmatprep.subr.bf16.mxu1 %v2969_v36  ;;  %v1456_v53 = vand.u32 4294901760, %v2254_v63  ;;  %v875_v29 = vand.u32 4294901760, %v874_v61  ;;  %v889_v0 = vand.u32 4294901760, %v888_v13  ;;  %v4299_v61 = vand.u32 4294901760, %v3600_v37 }
  0x33   :  { %3114 = vmatprep.subr.bf16.mxu0 %v3446_v40  ;;  %2563 = vmatprep.mubr.f32.mxu1 %v3479_v52 }
  0x34   :  { %2779 = vmatprep.mubr.f32.mxu0 %v3483_v55  ;;  %v867_v55 = vsub.f32 %v3472_v49, %v866_v57  ;;  %v3820_v24 = vsub.f32 %v2254_v63, %v1456_v53  ;;  %v902_v22 = vsub.f32 %v3600_v37, %v4299_v61  ;;  %v4301_v63 = vand.u32 4294901760, %v3638_v7 }
  0x35   :  { %2972 = vmatpush3.bf16.msra.mxu1 %v2969_v36  ;;  %v3796_v36 = vsub.f32 %v1444_v35, %v3774_v48  ;;  %v3811_v35 = vpack.c.bf16 %v1459_v62, %v1456_v53  ;;  %v3836_v53 = vsub.f32 %v2255_v31, %v1459_v62  ;;  %v2261_v62 = vld [vmem:[%s4213_s1 + $0xc8] sm:$0xff] }
  0x36   :  { %3116 = vmatpush3.bf16.msra.mxu0 %v3446_v40  ;;  %2974 = vmatprep.subr.bf16.mxu1 %v2973_v28  ;;  %v881_v40 = vsub.f32 %v3553_v51, %v4295_v11  ;;  %v868_v57 = vand.u32 4294901760, %v867_v55  ;;  %v895_v55 = vsub.f32 %v3594_v19, %v4298_v54  ;;  %v903_v61 = vand.u32 4294901760, %v902_v22 }
  0x37   :  { %3118 = vmatprep.subr.bf16.mxu0 %v3460_v43  ;;  %v1477_v22 = vand.u32 4294901760, %v2261_v62 }
  0x38   :  { %v882_v11 = vand.u32 4294901760, %v881_v40  ;;  %v4300_v40 = vand.u32 4294901760, %v3633_v10  ;;  %v896_v13 = vand.u32 4294901760, %v895_v55 }
  0x39   :  { %2976 = vmatpush3.bf16.msra.mxu1 %v2973_v28  ;;  %v3817_v28 = vpack.c.bf16 %v1465_v58, %v1462_v6 }
  0x3a   :  { %3120 = vmatpush3.bf16.msra.mxu0 %v3460_v43  ;;  %2561 = vmatprep.subr.mxu1 %v3679_v32  ;;  %v3822_v43 = vpack.c.bf16 %v875_v29, %v868_v57  ;;  %v3839_v29 = vand.u32 4294901760, %v3730_v47  ;;  %v909_v54 = vsub.f32 %v3633_v10, %v4300_v40  ;;  %v916_v57 = vsub.f32 %v3638_v7, %v4301_v63 }
  0x3b   :  { %2777 = vmatprep.subr.mxu0 %v3542_v42  ;;  %v3854_v31 = vpack.c.bf16 %v889_v0, %v882_v11  ;;  %v4302_v40 = vand.u32 4294901760, %v3796_v36  ;;  %v1474_v0 = vand.u32 4294901760, %v3834_v27  ;;  %v3874_v11 = vpack.c.bf16 %v3570_v12, %v3553_v51 }
  0x3c   :  { %4297 = vst [vmem:[#allocation18_spill] sm:$0xff] %v3822_v43  ;;  %v3861_v43 = vsub.f32 %v2257_v1, %v1465_v58  ;;  %v917_v25 = vand.u32 4294901760, %v916_v57  ;;  %v4304_v58 = vand.u32 4294901760, %v3787_v30  ;;  %v4305_v1 = vand.u32 4294901760, %v3792_v14 }
  0x3d   :  { %2562 = vmatpush3.msra.mxu1 %v3679_v32  ;;  %v3852_v32 = vsub.f32 %v2256_v56, %v1462_v6  ;;  %v1532_v63 = vsub.f32 %v3796_v36, %v4302_v40  ;;  %v3866_v6 = vpack.c.bf16 %v903_v61, %v896_v13  ;;  %v3870_v56 = vpack.c.bf16 %v3474_v50, %v3472_v49 }
  0x3e   :  { %2778 = vmatpush3.msra.mxu0 %v3542_v42  ;;  %2978 = vmatprep.subr.bf16.mxu1 %v3361_v15  ;;  %v910_v42 = vand.u32 4294901760, %v909_v54  ;;  %4303 = vst [vmem:[#allocation19_spill] sm:$0xff] %v3874_v11  ;;  %v3882_v55 = vpack.c.bf16 %v4305_v1, %v4304_v58  ;;  %v3888_v49 = vpack.c.bf16 %v3600_v37, %v3594_v19  ;;  %v4270_v50 = vand.u32 4294901760, %v3820_v24 }
  0x3f   :  { %3122 = vmatprep.subr.bf16.mxu0 %v3811_v35  ;;  %2564 = vmatmul.mubr.f32.vlgmr.msra.gmra.mrb[0].mxu1 %v3514_v2  ;;  %v4268_v51 = vand.u32 4294901760, %v3836_v53  ;;  %v3895_v12 = vand.u32 4294901760, %v3761_v21  ;;  %v3899_v57 = vpack.c.bf16 %v3638_v7, %v3633_v10  ;;  %v3905_v19 = vsub.f32 %v3730_v47, %v3839_v29 }
  0x40   :  { %2980 = vmatpush3.bf16.msra.mxu1 %v3361_v15  ;;  %2780 = vmatmul.mubr.f32.vlgmr.msra.gmra.mrb[0].mxu0 %v3516_v3  ;;  %v3884_v54 = vpack.c.bf16 %v917_v25, %v910_v42  ;;  %4306 = vst [vmem:[#allocation20_spill] sm:$0xff] %v3888_v49  ;;  %v1533_v42 = vand.u32 4294901760, %v1532_v63  ;;  %v3908_v37 = vand.u32 4294901760, %v3764_v9  ;;  %v4269_v25 = vand.u32 4294901760, %v3852_v32 }
  0x41   :  { %3124 = vmatpush3.bf16.msra.mxu0 %v3811_v35  ;;  %2982 = vmatprep.subr.bf16.mxu1 %v3387_v23  ;;  %4307 = vst [vmem:[#allocation21_spill] sm:$0xff] %v3899_v57  ;;  %v4271_v10 = vand.u32 4294901760, %v3861_v43  ;;  %v4308_v7 = vmov %v4304_v58  ;;  %v3921_v47 = vpack.c.bf16 %v1477_v22, %v1474_v0  ;;  %v4309_v61 = vmov %v4305_v1 }
  0x42   :  { %3126 = vmatprep.subr.bf16.mxu0 %v3817_v28  ;;  %2566 = vmatprep.mubr.f32.mxu1 %v3670_v18  ;;  %v3917_v13 = vsub.f32 %v3787_v30, %v4308_v7  ;;  %v3926_v40 = vsub.f32 %v3792_v14, %v4309_v61  ;;  %v4310_v63 = vand.u32 4294901760, %v3479_v52  ;;  %v1573_v30 = vsub.f32 %v3820_v24, %v4270_v50  ;;  %v2262_v14 = vld [vmem:[%s4213_s1 + $0xd0] sm:$0xff]  ;;  %s3292_s1 = smov 8  }
  0x43   :  { %2782 = vmatprep.mubr.f32.mxu0 %v3672_v26  ;;  %2567 = vmatmul.mubr.f32.gmra.mrb[2].mxu1 %v3686_v34  ;;  %v1580_v58 = vsub.f32 %v3836_v53, %v4268_v51  ;;  %v3939_v1 = vsub.f32 %v3761_v21, %v3895_v12  ;;  %v3947_v7 = vsub.f32 %v3764_v9, %v3908_v37 }
  0x44   :  { %2984 = vmatpush3.bf16.msra.mxu1 %v3387_v23  ;;  %2783 = vmatmul.mubr.f32.gmra.mrb[2].mxu0 %v3688_v33  ;;  %v1587_v61 = vsub.f32 %v3852_v32, %v4269_v25  ;;  %v1594_v21 = vsub.f32 %v3861_v43, %v4271_v10  ;;  %v3961_v9 = vsub.f32 %v3834_v27, %v1474_v0  ;;  %v3966_v25 = vand.u32 4294901760, %v2262_v14 }
  0x45   :  { %3128 = vmatpush3.bf16.msra.mxu0 %v3817_v28  ;;  %2986 = vmatprep.subr.bf16.mxu1 %v3440_v39  ;;  %v3963_v51 = vsub.f32 %v2261_v62, %v1477_v22  ;;  %v1574_v50 = vand.u32 4294901760, %v1573_v30  ;;  %v1581_v52 = vand.u32 4294901760, %v1580_v58  ;;  %v4312_v62 = vand.u32 4294901760, %v3917_v13 }
  0x46   :  { %3130 = vmatprep.subr.bf16.mxu0 %v3882_v55  ;;  %2587 = vmatprep.mubr.f32.mxu1 %v4310_v63  ;;  %v4311_v63 = vand.u32 4294901760, %v3905_v19  ;;  %v1588_v27 = vand.u32 4294901760, %v1587_v61  ;;  %v1595_v0 = vand.u32 4294901760, %v1594_v21  ;;  %v4313_v30 = vand.u32 4294901760, %v3464_v45 }
  0x47   :  { %2803 = vmatprep.mubr.f32.mxu0 %v1533_v42  ;;  %v4276_v42 = vand.u32 4294901760, %v3926_v40  ;;  %v1601_v22 = vsub.f32 %v3917_v13, %v4312_v62  ;;  %v4314_v58 = vand.u32 4294901760, %v3466_v46  ;;  %v3137_v62 = vpack.c.bf16 %v1581_v52, %v1574_v50 }
  0x48   :  { %2988 = vmatpush3.bf16.msra.mxu1 %v3440_v39  ;;  %v1542_v57 = vsub.f32 %v3905_v19, %v4311_v63  ;;  %v4315_v49 = vand.u32 4294901760, %v3939_v1  ;;  %v4316_v45 = vand.u32 4294901760, %v3947_v7  ;;  %v3141_v21 = vpack.c.bf16 %v1595_v0, %v1588_v27 }
  0x49   :  { %3132 = vmatpush3.bf16.msra.mxu0 %v3882_v55  ;;  %2990 = vmatprep.subr.bf16.mxu1 %v3452_v41  ;;  %v2993_v10 = vpack.c.bf16 %v4314_v58, %v4313_v30  ;;  %v1608_v63 = vsub.f32 %v3926_v40, %v4276_v42  ;;  %v4317_v30 = vand.u32 4294901760, %v3521_v4  ;;  %v4318_v58 = vand.u32 4294901760, %v3538_v38 }
  0x4a   :  { %3134 = vmatprep.subr.bf16.mxu0 %v3921_v47  ;;  %v1552_v33 = vsub.f32 %v3939_v1, %v4315_v49  ;;  %v1543_v26 = vand.u32 4294901760, %v1542_v57  ;;  %v1562_v46 = vsub.f32 %v3947_v7, %v4316_v45  ;;  %v1602_v61 = vand.u32 4294901760, %v1601_v22 }
  0x4b   :  { %v2997_v42 = vpack.c.bf16 %v4318_v58, %v4317_v30  ;;  %v1609_v50 = vand.u32 4294901760, %v1608_v63  ;;  %v4319_v49 = vand.u32 4294901760, %v3961_v9  ;;  %v4320_v52 = vand.u32 4294901760, %v3963_v51 }
  0x4c   :  { %2992 = vmatpush3.bf16.msra.mxu1 %v3452_v41  ;;  %v4008_v11 = vsub.f32 %v2262_v14, %v3966_v25  ;;  %v4321_v4 = vand.u32 4294901760, %v3514_v2  ;;  %v1553_v38 = vand.u32 4294901760, %v1552_v33  ;;  %v1563_v27 = vand.u32 4294901760, %v1562_v46  ;;  %v4337_v46 = vld [vmem:[#allocation9_spill] sm:$0xff] }
  0x4d   :  { %3136 = vmatpush3.bf16.msra.mxu0 %v3921_v47  ;;  %2585 = vmatprep.subr.mxu1 %v3525_v5  ;;  %v1615_v57 = vsub.f32 %v3961_v9, %v4319_v49  ;;  %v1622_v45 = vsub.f32 %v3963_v51, %v4320_v52  ;;  %v4322_v0 = vand.u32 4294901760, %v3575_v16  ;;  %v4323_v22 = vand.u32 4294901760, %v3580_v60  ;;  %v4339_v52 = vld [vmem:[#allocation8_spill] sm:$0xff] }
  0x4e   :  { %2801 = vmatprep.subr.mxu0 %v3966_v25  ;;  %v3145_v30 = vpack.c.bf16 %v1609_v50, %v1602_v61  ;;  %v4324_v49 = vand.u32 4294901760, %v3670_v18  ;;  %v4019_v2 = vand.u32 4294901760, %v4008_v11  ;;  %v4325_v33 = vand.u32 4294901760, %v3686_v34  ;;  %v4329_v61 = vld [vmem:[#allocation12_spill] sm:$0xff] }
  0x4f   :  { %v3001_v63 = vpack.c.bf16 %v4323_v22, %v4322_v0  ;;  %v1616_v58 = vand.u32 4294901760, %v1615_v57  ;;  %v1623_v14 = vand.u32 4294901760, %v1622_v45  ;;  %v4326_v16 = vand.u32 4294901760, %v3605_v8 }
  0x50   :  { %2586 = vmatpush3.msra.mxu1 %v3525_v5  ;;  %v4327_v60 = vand.u32 4294901760, %v3628_v17  ;;  %v1629_v18 = vsub.f32 %v4008_v11, %v4019_v2  ;;  %v3153_v17 = vpack.c.bf16 %v3836_v53, %v3820_v24  ;;  %v3157_v8 = vpack.c.bf16 %v3861_v43, %v3852_v32 }
  0x51   :  { %2802 = vmatpush3.msra.mxu0 %v3966_v25  ;;  %2994 = vmatprep.subr.bf16.mxu1 %v2993_v10  ;;  %v4338_v50 = vand.u32 4294901760, %v4337_v46  ;;  %v4343_v0 = vand.u32 4294901760, %v3836_v53  ;;  %v4349_v53 = vand.u32 4294901760, %v3905_v19 }
  0x52   :  { %3138 = vmatprep.subr.bf16.mxu0 %v3137_v62  ;;  %2588 = vmatmul.mubr.f32.vlgmr.msra.gmra.mrb[0].mxu1 %v4321_v4  ;;  %v1630_v34 = vand.u32 4294901760, %v1629_v18  ;;  %v4353_v18 = vand.u32 4294901760, %v3947_v7 }
  0x53   :  { %2996 = vmatpush3.bf16.msra.mxu1 %v2993_v10  ;;  %2804 = vmatmul.mubr.f32.vlgmr.msra.gmra.mrb[0].mxu0 %v1543_v26  ;;  %v3005_v26 = vpack.c.bf16 %v4327_v60, %v4326_v16  ;;  %v3149_v10 = vpack.c.bf16 %v1623_v14, %v1616_v58  ;;  %v836_v57 = vsub.f32 %v4337_v46, %v4338_v50  ;;  %v4346_v14 = vld [vmem:[#allocation18_spill] sm:$0xff] }
  0x54   :  { %3140 = vmatpush3.bf16.msra.mxu0 %v3137_v62  ;;  %2998 = vmatprep.subr.bf16.mxu1 %v2997_v42  ;;  %v4336_v62 = vld [vmem:[#allocation5_spill] sm:$0xff] }
  0x55   :  { %3142 = vmatprep.subr.bf16.mxu0 %v3141_v21  ;;  %2590 = vmatprep.mubr.f32.mxu1 %v4324_v49  ;;  %v4347_v49 = vand.u32 4294901760, %v3852_v32  ;;  %v4351_v32 = vand.u32 4294901760, %v3926_v40 }
  0x56   :  { %2806 = vmatprep.mubr.f32.mxu0 %v1553_v38  ;;  %2591 = vmatmul.mubr.f32.gmra.mrb[2].mxu1 %v4325_v33  ;;  %v837_v38 = vand.u32 4294901760, %v836_v57  ;;  %v4348_v33 = vand.u32 4294901760, %v3861_v43  ;;  %v4352_v43 = vand.u32 4294901760, %v3939_v1 }
  0x57   :  { %3000 = vmatpush3.bf16.msra.mxu1 %v2997_v42  ;;  %2807 = vmatmul.mubr.f32.gmra.mrb[2].mxu0 %v1563_v27  ;;  %v4328_v42 = vld [vmem:[#allocation10_spill] sm:$0xff]  ;;  %v4342_v27 = vand.u32 4294901760, %v3820_v24 }
  0x58   :  { %3144 = vmatpush3.bf16.msra.mxu0 %v3141_v21  ;;  %3002 = vmatprep.subr.bf16.mxu1 %v3001_v63  ;;  %v3189_v16 = vpack.c.bf16 %v4348_v33, %v4347_v49 }
  0x59   :  { %3146 = vmatprep.subr.bf16.mxu0 %v3145_v30  ;;  %2611 = vmatprep.mubr.f32.mxu1 %v3462_v44  ;;  %v3185_v22 = vpack.c.bf16 %v4343_v0, %v4342_v27 }
  0x5a   :  { %2827 = vmatprep.mubr.f32.mxu0 %v3774_v48 }
  0x5b   :  { %3004 = vmatpush3.bf16.msra.mxu1 %v3001_v63  ;;  %v4344_v63 = vld [vmem:[#allocation16_spill] sm:$0xff] }
  0x5c   :  { %3148 = vmatpush3.bf16.msra.mxu0 %v3145_v30  ;;  %3006 = vmatprep.subr.bf16.mxu1 %v3005_v26  ;;  %v4345_v30 = vand.u32 4294901760, %v4344_v63 }
  0x5d   :  { %3150 = vmatprep.subr.bf16.mxu0 %v3149_v10 }
  0x5e   :  { %v856_v58 = vsub.f32 %v4344_v63, %v4345_v30 }
  0x5f   :  { %3008 = vmatpush3.bf16.msra.mxu1 %v3005_v26  ;;  %v4350_v26 = vand.u32 4294901760, %v3917_v13 }
  0x60   :  { %3152 = vmatpush3.bf16.msra.mxu0 %v3149_v10  ;;  %2609 = vmatprep.subr.mxu1 %v3695_v20  ;;  %v857_v24 = vand.u32 4294901760, %v856_v58 }
  0x61   :  { %2825 = vmatprep.subr.mxu0 %v1630_v34  ;;  %v3193_v10 = vpack.c.bf16 %v4351_v32, %v4350_v26 }
  0x63   :  { %2610 = vmatpush3.msra.mxu1 %v3695_v20  ;;  %v3161_v20 = vpack.c.bf16 %v3926_v40, %v3917_v13  ;;  %v4356_v13 = vand.u32 4294901760, %v3961_v9  ;;  %v4357_v40 = vand.u32 4294901760, %v3963_v51 }
  0x64   :  { %2826 = vmatpush3.msra.mxu0 %v1630_v34  ;;  %3010 = vmatprep.subr.bf16.mxu1 %v3361_v15  ;;  %v4355_v34 = vld [vmem:[#allocation15_spill] sm:$0xff] }
  0x65   :  { %3154 = vmatprep.subr.bf16.mxu0 %v3153_v17  ;;  %2612 = vmatmul.mubr.f32.vlgmr.msra.gmra.mrb[0].mxu1 %v3494_v59 }
  0x66   :  { %3012 = vmatpush3.bf16.msra.mxu1 %v3361_v15  ;;  %2828 = vmatmul.mubr.f32.vlgmr.msra.gmra.mrb[0].mxu0 %v3839_v29  ;;  %v3165_v15 = vpack.c.bf16 %v3963_v51, %v3961_v9  ;;  %v4361_v51 = vld [vmem:[#allocation14_spill] sm:$0xff] }
  0x67   :  { %3156 = vmatpush3.bf16.msra.mxu0 %v3153_v17  ;;  %3014 = vmatprep.subr.bf16.mxu1 %v3387_v23 }
  0x68   :  { %3158 = vmatprep.subr.bf16.mxu0 %v3157_v8  ;;  %2614 = vmatprep.mubr.f32.mxu1 %v4328_v42 }
  0x69   :  { %2830 = vmatprep.mubr.f32.mxu0 %v3895_v12  ;;  %2615 = vmatmul.mubr.f32.gmra.mrb[2].mxu1 %v4329_v61 }
  0x6a   :  { %3016 = vmatpush3.bf16.msra.mxu1 %v3387_v23  ;;  %2831 = vmatmul.mubr.f32.gmra.mrb[2].mxu0 %v3908_v37  ;;  %v4330_v23 = vld [vmem:[#allocation7_spill] sm:$0xff] }
  0x6b   :  { %3160 = vmatpush3.bf16.msra.mxu0 %v3157_v8  ;;  %3018 = vmatprep.subr.bf16.mxu1 %v3440_v39  ;;  %v4331_v21 = vand.u32 4294901760, %v4330_v23  ;;  %v3197_v8 = vpack.c.bf16 %v4357_v40, %v4356_v13 }
  0x6c   :  { %3162 = vmatprep.subr.bf16.mxu0 %v3161_v20  ;;  %2635 = vmatprep.mubr.f32.mxu1 %v3462_v44 }
  0x6d   :  { %2851 = vmatprep.mubr.f32.mxu0 %v3796_v36  ;;  %v826_v44 = vsub.f32 %v4330_v23, %v4331_v21 }
  0x6e   :  { %3020 = vmatpush3.bf16.msra.mxu1 %v3440_v39  ;;  %v4332_v39 = vld [vmem:[#allocation2_spill] sm:$0xff] }
  0x6f   :  { %3164 = vmatpush3.bf16.msra.mxu0 %v3161_v20  ;;  %3022 = vmatprep.subr.bf16.mxu1 %v3452_v41 }
  0x70   :  { %3166 = vmatprep.subr.bf16.mxu0 %v3165_v15 }
  0x72   :  { %3024 = vmatpush3.bf16.msra.mxu1 %v3452_v41  ;;  %v4333_v41 = vld [vmem:[#allocation3_spill] sm:$0xff] }
  0x73   :  { %3168 = vmatpush3.bf16.msra.mxu0 %v3165_v15  ;;  %2633 = vmatprep.subr.mxu1 %v3525_v5 }
  0x74   :  { %2849 = vmatprep.subr.mxu0 %v4008_v11 }
  0x76   :  { %2634 = vmatpush3.msra.mxu1 %v3525_v5  ;;  %v827_v5 = vand.u32 4294901760, %v826_v44 }
  0x77   :  { %2850 = vmatpush3.msra.mxu0 %v4008_v11  ;;  %3026 = vmatprep.subr.bf16.mxu1 %v4332_v39  ;;  %v4335_v11 = vand.u32 4294901760, %v3796_v36  ;;  %v4340_v36 = vld [vmem:[#allocation13_spill] sm:$0xff] }
  0x78   :  { %3170 = vmatprep.subr.bf16.mxu0 %v3811_v35  ;;  %2636 = vmatmul.mubr.f32.vlgmr.msra.gmra.mrb[0].mxu1 %v3494_v59  ;;  %v4334_v59 = vld [vmem:[#allocation4_spill] sm:$0xff]  ;;  %v4341_v45 = vand.u32 4294901760, %v4340_v36 }
  0x79   :  { %3028 = vmatpush3.bf16.msra.mxu1 %v4332_v39  ;;  %2852 = vmatmul.mubr.f32.vlgmr.msra.gmra.mrb[0].mxu0 %v3905_v19  ;;  %v4354_v19 = vld [vmem:[#allocation17_spill] sm:$0xff] }
  0x7a   :  { %3172 = vmatpush3.bf16.msra.mxu0 %v3811_v35  ;;  %3030 = vmatprep.subr.bf16.mxu1 %v4333_v41  ;;  %v846_v4 = vsub.f32 %v4340_v36, %v4341_v45  ;;  %v923_v17 = vsub.f32 %v4355_v34, %v4354_v19  ;;  %v2188_v19 = vlaneseq }
  0x7b   :  { %3174 = vmatprep.subr.bf16.mxu0 %v3817_v28  ;;  %2638 = vmatprep.mubr.f32.mxu1 %v4328_v42 }
  0x7c   :  { %2854 = vmatprep.mubr.f32.mxu0 %v3939_v1  ;;  %2639 = vmatmul.mubr.f32.gmra.mrb[2].mxu1 %v4329_v61  ;;  %v847_v60 = vand.u32 4294901760, %v846_v4  ;;  %v4358_v1 = vld [vmem:[#allocation6_spill] sm:$0xff] }
  0x7d   :  { %3032 = vmatpush3.bf16.msra.mxu1 %v4333_v41  ;;  %2855 = vmatmul.mubr.f32.gmra.mrb[2].mxu0 %v3947_v7 }
  0x7e   :  { %3176 = vmatpush3.bf16.msra.mxu0 %v3817_v28  ;;  %3034 = vmatprep.subr.bf16.mxu1 %v4334_v59 }
  0x7f   :  { %3178 = vmatprep.subr.bf16.mxu0 %v3882_v55  ;;  %2659 = vmatprep.mubr.f32.mxu1 %v827_v5 }
  0x80   :  { %2875 = vmatprep.mubr.f32.mxu0 %v4335_v11 }
  0x81   :  { %3036 = vmatpush3.bf16.msra.mxu1 %v4334_v59 }
  0x82   :  { %3180 = vmatpush3.bf16.msra.mxu0 %v3882_v55  ;;  %3038 = vmatprep.subr.bf16.mxu1 %v4336_v62 }
  0x83   :  { %3182 = vmatprep.subr.bf16.mxu0 %v3921_v47 }
  0x85   :  { %3040 = vmatpush3.bf16.msra.mxu1 %v4336_v62 }
  0x86   :  { %3184 = vmatpush3.bf16.msra.mxu0 %v3921_v47  ;;  %2657 = vmatprep.subr.mxu1 %v4339_v52 }
  0x87   :  { %2873 = vmatprep.subr.mxu0 %v3966_v25 }
  0x89   :  { %2658 = vmatpush3.msra.mxu1 %v4339_v52 }
  0x8a   :  { %2874 = vmatpush3.msra.mxu0 %v3966_v25  ;;  %3042 = vmatprep.subr.bf16.mxu1 %v4346_v14 }
  0x8b   :  { %3186 = vmatprep.subr.bf16.mxu0 %v3185_v22  ;;  %2660 = vmatmul.mubr.f32.vlgmr.msra.gmra.mrb[0].mxu1 %v837_v38 }
  0x8c   :  { %3044 = vmatpush3.bf16.msra.mxu1 %v4346_v14  ;;  %2876 = vmatmul.mubr.f32.vlgmr.msra.gmra.mrb[0].mxu0 %v4349_v53 }
  0x8d   :  { %3188 = vmatpush3.bf16.msra.mxu0 %v3185_v22  ;;  %3046 = vmatprep.subr.bf16.mxu1 %v3854_v31 }
  0x8e   :  { %3190 = vmatprep.subr.bf16.mxu0 %v3189_v16  ;;  %2662 = vmatprep.mubr.f32.mxu1 %v847_v60 }
  0x8f   :  { %2878 = vmatprep.mubr.f32.mxu0 %v4352_v43  ;;  %2663 = vmatmul.mubr.f32.gmra.mrb[2].mxu1 %v857_v24  ;;  %v3296_v43 = vmov 1966171168  }
  0x90   :  { %3048 = vmatpush3.bf16.msra.mxu1 %v3854_v31  ;;  %2879 = vmatmul.mubr.f32.gmra.mrb[2].mxu0 %v4353_v18  ;;  %v924_v31 = vand.u32 4294901760, %v923_v17  ;;  %v2186_v18 = vunpack.c.l.s4 %v3296_v43  ;;  %v2189_v17 = vshrl.u32 %v2188_v19, 7 }
  0x91   :  { %3192 = vmatpush3.bf16.msra.mxu0 %v3189_v16  ;;  %3050 = vmatprep.subr.bf16.mxu1 %v3866_v6 }
  0x92   :  { %3194 = vmatprep.subr.bf16.mxu0 %v3193_v10  ;;  %2683 = vmatprep.mubr.f32.mxu1 %v4358_v1 }
  0x93   :  { %2899 = vmatprep.mubr.f32.mxu0 %v3774_v48 }
  0x94   :  { %3052 = vmatpush3.bf16.msra.mxu1 %v3866_v6  ;;  %v4359_v6 = vld [vmem:[#allocation19_spill] sm:$0xff] }
  0x95   :  { %3196 = vmatpush3.bf16.msra.mxu0 %v3193_v10  ;;  %3054 = vmatprep.subr.bf16.mxu1 %v3884_v54 }
  0x96   :  { %3198 = vmatprep.subr.bf16.mxu0 %v3197_v8 }
  0x98   :  { %3056 = vmatpush3.bf16.msra.mxu1 %v3884_v54  ;;  %v4360_v54 = vld [vmem:[#allocation11_spill] sm:$0xff] }
  0x99   :  { %3200 = vmatpush3.bf16.msra.mxu0 %v3197_v8  ;;  %2681 = vmatprep.subr.mxu1 %v924_v31 }
  0x9a   :  { %2897 = vmatprep.subr.mxu0 %v4019_v2 }
  0x9c   :  { %2682 = vmatpush3.msra.mxu1 %v924_v31  ;;  %v2181_v31 = vld [vmem:[%s4215_s2] sm:$0x1] }
  0x9d   :  { %2898 = vmatpush3.msra.mxu0 %v4019_v2  ;;  %3058 = vmatprep.subr.bf16.mxu1 %v3870_v56 }
  0x9e   :  { %3202 = vmatprep.subr.bf16.mxu0 %v3811_v35  ;;  %2684 = vmatmul.mubr.f32.vlgmr.msra.gmra.mrb[0].mxu1 %v3516_v3  ;;  %v4362_v3 = vld [vmem:[#allocation20_spill] sm:$0xff] }
  0x9f   :  { %3060 = vmatpush3.bf16.msra.mxu1 %v3870_v56  ;;  %2900 = vmatmul.mubr.f32.vlgmr.msra.gmra.mrb[0].mxu0 %v3839_v29 }
  0xa0   :  { %3204 = vmatpush3.bf16.msra.mxu0 %v3811_v35  ;;  %3062 = vmatprep.subr.bf16.mxu1 %v4359_v6  ;;  %v4363_v35 = vld [vmem:[#allocation21_spill] sm:$0xff] }
  0xa1   :  { %3206 = vmatprep.subr.bf16.mxu0 %v3817_v28  ;;  %2686 = vmatprep.mubr.f32.mxu1 %v4360_v54 }
  0xa2   :  { %2902 = vmatprep.mubr.f32.mxu0 %v3895_v12  ;;  %2687 = vmatmul.mubr.f32.gmra.mrb[2].mxu1 %v4361_v51 }
  0xa3   :  { %3064 = vmatpush3.bf16.msra.mxu1 %v4359_v6  ;;  %2903 = vmatmul.mubr.f32.gmra.mrb[2].mxu0 %v3908_v37  ;;  %v2208_v6 = vsub.s32 0, %v2189_v17 }
  0xa4   :  { %3208 = vmatpush3.bf16.msra.mxu0 %v3817_v28  ;;  %3066 = vmatprep.subr.bf16.mxu1 %v4362_v3 }
  0xa5   :  { %3210 = vmatprep.subr.bf16.mxu0 %v3882_v55  ;;  %2707 = vmatprep.mubr.f32.mxu1 %v4330_v23 }
  0xa6   :  { %2923 = vmatprep.mubr.f32.mxu0 %v3774_v48 }
  0xa7   :  { %3068 = vmatpush3.bf16.msra.mxu1 %v4362_v3  ;;  %v2202_v3 = vld [vmem:[%s4216_s3] sm:$0x1] }
  0xa8   :  { %3212 = vmatpush3.bf16.msra.mxu0 %v3882_v55  ;;  %3070 = vmatprep.subr.bf16.mxu1 %v4363_v35 }
  0xa9   :  { %3214 = vmatprep.subr.bf16.mxu0 %v3921_v47 }
  0xab   :  { %3072 = vmatpush3.bf16.msra.mxu1 %v4363_v35 }
  0xac   :  { %3216 = vmatpush3.bf16.msra.mxu0 %v3921_v47  ;;  %2705 = vmatprep.subr.mxu1 %v4355_v34 }
  0xad   :  { %2921 = vmatprep.subr.mxu0 %v3966_v25 }
  0xaf   :  { %2706 = vmatpush3.msra.mxu1 %v4355_v34  ;;  %v2187_v34 = vunpack.c.0.s8 %v2186_v18 }
  0xb0   :  { %2922 = vmatpush3.msra.mxu0 %v3966_v25  ;;  %2708 = vmatmul.mubr.f32.vlgmr.msra.gmra.mrb[0].mxu1 %v4337_v46 }
  0xb1   :  { %2924 = vmatmul.mubr.f32.vlgmr.msra.gmra.mrb[0].mxu0 %v3839_v29  ;;  %2710 = vmatprep.mubr.f32.mxu1 %v4340_v36  ;;  %v2190_v13 = vsub.s32 %v2187_v34, %v2189_v17 }
  0xb2   :  { %2926 = vmatprep.mubr.f32.mxu0 %v3895_v12 }
  0xb4   :  { %2711 = vmatmul.mubr.f32.gmra.mrb[2].mxu1 %v4344_v63 }
  0xb5   :  { %2927 = vmatmul.mubr.f32.gmra.mrb[2].mxu0 %v3908_v37 }
 0x183   :  { %v2709_v48 = vpop.f32.mrb[0].mxu1 }
 0x184   :  { %v2925_v28 = vpop.f32.mrb[0].mxu0  ;;  %v1083_v56 = vpop.f32.mrb[1].mxu1 }
 0x185   :  { %v4171_v55 = vadd.f32 %v2925_v28, %v2709_v48  ;;  %v2112_v47 = vpop.f32.mrb[1].mxu0 }
 0x186   :  { %v4173_v7 = vadd.f32 %v2112_v47, %v1083_v56 }
 0x187   :  { %v2712_v25 = vpop.f32.mrb[2].mxu1  ;;  %v2148_v29 = vmul.f32 %v4171_v55, %v4171_v55 }
 0x188   :  { %v2147_v9 = vmul.f32 %v4173_v7, %v4173_v7  ;;  %v2928_v12 = vpop.f32.mrb[2].mxu0  ;;  %v1097_v2 = vpop.f32.mrb[3].mxu1  ;;  %v2138_v42 = vadd.f32 %v4173_v7, %v4171_v55 }
 0x189   :  { %v4179_v20 = vadd.f32 %v2928_v12, %v2712_v25  ;;  %v2124_v37 = vpop.f32.mrb[3].mxu0 }
 0x18a   :  { %v4183_v61 = vadd.f32 %v2124_v37, %v1097_v2  ;;  %v2151_v15 = vadd.f32 %v2148_v29, %v2147_v9 }
 0x18b   :  { %v2150_v44 = vmul.f32 %v4179_v20, %v4179_v20 }
 0x18c   :  { %v2139_v23 = vadd.f32 %v4183_v61, %v2138_v42  ;;  %v2149_v21 = vmul.f32 %v4183_v61, %v4183_v61 }
 0x18e   :  { %v2140_v39 = vadd.f32 %v4179_v20, %v2139_v23  ;;  %v2152_v41 = vadd.f32 %v2151_v15, %v2149_v21 }
 0x190   :  { %v2141_v5 = vrot.slane %v2140_v39, 4  ;;  %v2153_v59 = vadd.f32 %v2152_v41, %v2150_v44 }
 0x192   :  { %v2142_v11 = vadd.f32 %v2141_v5, %v2140_v39  ;;  %v2154_v62 = vrot.slane %v2153_v59, 4 }
 0x194   :  { %v2143_v46 = vrot.slane %v2142_v11, 2  ;;  %v2155_v50 = vadd.f32 %v2154_v62, %v2153_v59 }
 0x196   :  { %v2144_v57 = vadd.f32 %v2143_v46, %v2142_v11  ;;  %v2156_v52 = vrot.slane %v2155_v50, 2 }
 0x198   :  { %v2145_v36 = vrot.slane %v2144_v57, 1  ;;  %v2157_v45 = vadd.f32 %v2156_v52, %v2155_v50 }
 0x19a   :  { %v2158_v4 = vrot.slane %v2157_v45, 1  ;;  %v2146_v38 = vadd.f32 %v2145_v36, %v2144_v57 }
 0x19c   :  { %v2159_v27 = vadd.f32 %v2158_v4, %v2157_v45 }
 0x19e   :  { %v2161_v0 = vsel %vm2160_vm1, %v2146_v38, %v2159_v27 }
 0x19f   :  { %2162 = vrot.lane.b32.xlu0 %v2161_v0, %s3292_s1 }
 0x211   :  { %v2163_v22 = vpop.permute.xlu0 %2162 }
 0x212   :  { %v2164_v63 = vadd.f32 %v2163_v22, %v2161_v0 }
 0x214   :  { %2165 = vrot.lane.b32.xlu0 %v2164_v63, %s3293_s14 }
 0x286   :  { %v2166_v30 = vpop.permute.xlu0 %2165 }
 0x287   :  { %v2167_v58 = vadd.f32 %v2166_v30, %v2164_v63 }
 0x289   :  { %2168 = vrot.lane.b32.xlu1 %v2167_v58, %s3294_s15 }
 0x2fb   :  { %v2169_v14 = vpop.permute.xlu1 %2168 }
 0x2fc   :  { %v2170_v49 = vadd.f32 %v2169_v14, %v2167_v58 }
 0x2fe   :  { %2171 = vrot.lane.b32.xlu1 %v2170_v49, %s3295_s16 }
 0x370   :  { %v2172_v33 = vpop.permute.xlu1 %2171 }
 0x371   :  { %v2173_v16 = vadd.f32 %v2172_v33, %v2170_v49 }
 0x373   :  { %v2174_v60 = vmul.f32 0.001953125, %v2173_v16 }
 0x375   :  { %v2175_v24 = vmul.f32 %v2174_v60, %v2174_v60 }
 0x377   :  { %v2177_v53 = vrot.slane %v2175_v24, 7 }
 0x379   :  { %v2179_v26 = vsub.f32 %v2174_v60, %v2177_v53 }
 0x37b   :  { %v2180_v32 = vmax.f32 %v2179_v26, 0.0 }
 0x37d   :  { %v2182_v10 = vadd.f32 1e-05, %v2180_v32 }
 0x37f   :  { %3290 = vrsqrt.f32 %v2182_v10 }
 0x389   :  { %v3291_v40 = vpop.eup %3290 }
 0x38a   :  { %v2191_v8 = vrot.slane %v3291_v40, %v2190_v13 }
 0x38c   :  { %v2192_v1 = vcombine.high %v2191_v8, %v2191_v8 }
 0x38e   :  { %v2199_v54 = vrot.slane %v2192_v1, %v2190_v13 }
 0x390   :  { %v2201_v51 = vmul.f32 %v2199_v54, %v2181_v31 }
 0x392   :  { %v2203_v35 = vmul.f32 %v2201_v51, %v2174_v60  ;;  %v2209_v48 = vrot.slane %v2201_v51, %v2208_v6 }
 0x394   :  { %v2204_v28 = vsub.f32 %v2202_v3, %v2203_v35  ;;  %v2211_v56 = vmul.f32 %v4173_v7, %v2209_v48  ;;  %v2212_v47 = vmul.f32 %v4171_v55, %v2209_v48  ;;  %v2213_v25 = vmul.f32 %v4183_v61, %v2209_v48 }
 0x395   :  { %v2214_v29 = vmul.f32 %v4179_v20, %v2209_v48 }
 0x396   :  { %v2219_v9 = vrot.slane %v2204_v28, %v2208_v6 }
 0x398   :  { %v2221_v12 = vadd.f32 %v2219_v9, %v2211_v56  ;;  %v2222_v2 = vadd.f32 %v2219_v9, %v2212_v47  ;;  %v2223_v37 = vadd.f32 %v2219_v9, %v2213_v25  ;;  %v2224_v42 = vadd.f32 %v2219_v9, %v2214_v29 }
 0x39a   :  { %v2225_v15 = vmax.f32 %v2221_v12, 0.0  ;;  %v2226_v23 = vmax.f32 %v2222_v2, 0.0  ;;  %v2227_v21 = vmax.f32 %v2223_v37, 0.0  ;;  %v2228_v44 = vmax.f32 %v2224_v42, 0.0 }
 0x39c   :  { %2229 = vst [vmem:[%s4217_s4] sm:$0xff] %v2225_v15  ;;  %2230 = vst [vmem:[%s4217_s4 + $0x8] sm:$0xff] %v2226_v23 }
 0x39d   :  { %2231 = vst [vmem:[%s4217_s4 + $0x10] sm:$0xff] %v2227_v21  ;;  %2232 = vst [vmem:[%s4217_s4 + $0x18] sm:$0xff] %v2228_v44 }

</bundles_post_ra>
